<compile_context>
chip_gen: v5e
topology: v5e:2x2
jax: 0.10.0
libtpu: 0.0.40
codegen_flags: <defaults>
</compile_context>

<pallas_src>
import functools

import jax
import jax.numpy as jnp
from jax.experimental import pallas as pl
from jax.experimental.pallas import tpu as pltpu

LATENT_DIM = 8
HIDDEN1 = 16
HIDDEN2 = 32
OUTPUT_SIZE = 140


def _round_up(x, m):
    return ((x + m - 1) // m) * m


def decoder_kernel(zt_ref, w1_ref, b1_ref, w2_ref, b2_ref, w3_ref, b3_ref, ot_ref):
    # Feature-major layout: batch is the lane dimension, so every activation
    # tile is lane-dense and the 140-row output store is unmasked.
    zt = zt_ref[...]                                                     # (8,   TB)
    # fc1 + ReLU (f32 accumulation on the MXU)
    h1 = jnp.dot(w1_ref[...], zt, preferred_element_type=jnp.float32) + b1_ref[...]
    h1 = jnp.maximum(h1, 0.0)                                            # (16,  TB)
    # fc2 + ReLU
    h2 = jnp.dot(w2_ref[...], h1, preferred_element_type=jnp.float32) + b2_ref[...]
    h2 = jnp.maximum(h2, 0.0)                                            # (32,  TB)
    # fc3 + exact sigmoid (single EUP op, exact numerics)
    logits = jnp.dot(w3_ref[...], h2, preferred_element_type=jnp.float32) + b3_ref[...]
    ot_ref[...] = jax.nn.sigmoid(logits)                                 # (140, TB)


@functools.partial(jax.jit, static_argnames=("tb",))
def decoder_forward(z, params, *, tb=4096):
    """z: (B, 8) float32 -> (B, 140) float32 (same semantics as the torch module)."""
    w1, b1, w2, b2, w3, b3 = params
    B = z.shape[0]

    # Batch tile on the lane axis: must be a multiple of 128 or equal to B.
    tb = _round_up(max(tb, 128), 128)
    if B <= tb:
        if B <= 1024:
            TB = B                                    # one step: block == full batch
        else:
            TB = _round_up(pl.cdiv(B, 2), 128)        # >= 2 steps -> both v7x TCs busy
    else:
        TB = tb
    grid = (pl.cdiv(B, TB),)

    zt = z.T  # (LATENT_DIM, B): batch in the lane dimension

    const = lambda i: (0, 0)  # weights/biases: VMEM-resident, never re-DMA'd

    out_t = pl.pallas_call(
        decoder_kernel,
        out_shape=jax.ShapeDtypeStruct((OUTPUT_SIZE, B), jnp.float32),
        grid=grid,
        in_specs=[
            pl.BlockSpec((LATENT_DIM, TB), lambda i: (0, i)),      # z^T (streamed)
            pl.BlockSpec((HIDDEN1, LATENT_DIM), const),            # w1 (16, 8)
            pl.BlockSpec((HIDDEN1, 1), const),                     # b1 (16, 1)
            pl.BlockSpec((HIDDEN2, HIDDEN1), const),               # w2 (32, 16)
            pl.BlockSpec((HIDDEN2, 1), const),                     # b2 (32, 1)
            pl.BlockSpec((OUTPUT_SIZE, HIDDEN2), const),           # w3 (140, 32)
            pl.BlockSpec((OUTPUT_SIZE, 1), const),                 # b3 (140, 1)
        ],
        out_specs=pl.BlockSpec((OUTPUT_SIZE, TB), lambda i: (0, i)),  # out^T (streamed)
        compiler_params=pltpu.CompilerParams(
            # Batch axis is independent across tiles; lets Mosaic shard it
            # across both v7x TensorCores (no-op on single-TC v5e/v6e).
            dimension_semantics=("parallel",),
            # ~10 MiB actually used at TB=4096; 48 MiB leaves headroom for
            # larger tb while staying under v7x's 64 MiB physical VMEM.
            vmem_limit_bytes=48 * 1024 * 1024,
        ),
    )(zt, w1, b1, w2, b2, w3, b3)

    return out_t.T  # back to (B, OUTPUT_SIZE)


def init_params(key):
    """Deterministic init matching torch.nn.Linear.

    Weights are stored (out_features, in_features) exactly like torch; biases
    as (out_features, 1) columns so they broadcast along the batch lanes.
    Uniform(-1/sqrt(fan_in), 1/sqrt(fan_in)) like torch's default init.
    """
    ks = jax.random.split(key, 6)

    def linear(kw, kb, fan_in, fan_out):
        bound = 1.0 / jnp.sqrt(fan_in)
        w = jax.random.uniform(kw, (fan_out, fan_in), jnp.float32, -bound, bound)
        b = jax.random.uniform(kb, (fan_out, 1), jnp.float32, -bound, bound)
        return w, b

    w1, b1 = linear(ks[0], ks[1], LATENT_DIM, HIDDEN1)
    w2, b2 = linear(ks[2], ks[3], HIDDEN1, HIDDEN2)
    w3, b3 = linear(ks[4], ks[5], HIDDEN2, OUTPUT_SIZE)
    return (w1, b1, w2, b2, w3, b3)


def reference_forward(z, params):
    w1, b1, w2, b2, w3, b3 = params
    h1 = jnp.maximum(z @ w1.T + b1.T, 0.0)
    h2 = jnp.maximum(h1 @ w2.T + b2.T, 0.0)
    return jax.nn.sigmoid(h2 @ w3.T + b3.T)


if __name__ == "__main__":
    key = jax.random.PRNGKey(0)
    kp, kz1, kz2 = jax.random.split(key, 3)
    params = init_params(kp)

    # Small case: single grid step (TB == B).
    B = 8
    z = jax.random.normal(kz1, (B, LATENT_DIM), jnp.float32)
    out = jax.block_until_ready(decoder_forward(z, params))
    ref = reference_forward(z, params)
    assert out.shape == (B, OUTPUT_SIZE)
    assert jnp.allclose(out, ref, atol=1e-4, rtol=1e-4), float(jnp.max(jnp.abs(out - ref)))

    # Multi-step grid (lane-aligned 128-wide tiles + a partial remainder block)
    # to exercise the pipelined path.
    B2 = 200
    z2 = jax.random.normal(kz2, (B2, LATENT_DIM), jnp.float32)
    out2 = jax.block_until_ready(decoder_forward(z2, params, tb=128))
    ref2 = reference_forward(z2, params)
    assert out2.shape == (B2, OUTPUT_SIZE)
    assert jnp.allclose(out2, ref2, atol=1e-4, rtol=1e-4), float(jnp.max(jnp.abs(out2 - ref2)))

    print("KERNEL_OK")
</pallas_src>

<mosaic_0001>
module attributes {stable_mosaic.version = 11 : i64} {
  func.func @decoder_kernel(%arg0: i32, %arg1: memref<8x8xf32, #tpu.memory_space<vmem>>, %arg2: memref<16x8xf32, #tpu.memory_space<vmem>>, %arg3: memref<16x1xf32, #tpu.memory_space<vmem>>, %arg4: memref<32x16xf32, #tpu.memory_space<vmem>>, %arg5: memref<32x1xf32, #tpu.memory_space<vmem>>, %arg6: memref<140x32xf32, #tpu.memory_space<vmem>>, %arg7: memref<140x1xf32, #tpu.memory_space<vmem>>, %arg8: memref<140x8xf32, #tpu.memory_space<vmem>>) attributes {dimension_semantics = [#tpu.dimension_semantics<parallel>], iteration_bounds = array<i64: 1>, scalar_prefetch = 0 : i64, scratch_operands = 0 : i64, tpu.core_type = #tpu.core_type<tc>, window_params = [{transform_indices = @transform_0, window_bounds = array<i64: 8, 8>}, {pipeline_mode = #tpu.pipeline_mode<synchronous>, transform_indices = @transform_1, window_bounds = array<i64: 16, 8>}, {pipeline_mode = #tpu.pipeline_mode<synchronous>, transform_indices = @transform_2, window_bounds = array<i64: 16, 1>}, {pipeline_mode = #tpu.pipeline_mode<synchronous>, transform_indices = @transform_3, window_bounds = array<i64: 32, 16>}, {pipeline_mode = #tpu.pipeline_mode<synchronous>, transform_indices = @transform_4, window_bounds = array<i64: 32, 1>}, {pipeline_mode = #tpu.pipeline_mode<synchronous>, transform_indices = @transform_5, window_bounds = array<i64: 140, 32>}, {pipeline_mode = #tpu.pipeline_mode<synchronous>, transform_indices = @transform_6, window_bounds = array<i64: 140, 1>}, {transform_indices = @transform_7, window_bounds = array<i64: 140, 8>}]} {
    %c0 = arith.constant 0 : index
    %c0_0 = arith.constant 0 : index
    %0 = vector.load %arg1[%c0, %c0_0] : memref<8x8xf32, #tpu.memory_space<vmem>>, vector<8x8xf32>
    %c0_1 = arith.constant 0 : index
    %c0_2 = arith.constant 0 : index
    %1 = vector.load %arg2[%c0_1, %c0_2] : memref<16x8xf32, #tpu.memory_space<vmem>>, vector<16x8xf32>
    %cst = arith.constant dense<0.000000e+00> : vector<16x8xf32>
    %2 = tpu.matmul %1, %0, %cst {dimension_numbers = #tpu.dot_dimension_numbers<[1], [0], [0], [1], [0, 0, 1, 1], [], []>} : vector<16x8xf32>, vector<8x8xf32>, vector<16x8xf32> -> vector<16x8xf32>
    %c0_3 = arith.constant 0 : index
    %c0_4 = arith.constant 0 : index
    %3 = vector.load %arg3[%c0_3, %c0_4] : memref<16x1xf32, #tpu.memory_space<vmem>>, vector<16x1xf32>
    %4 = vector.broadcast %3 : vector<16x1xf32> to vector<16x8xf32>
    %5 = arith.addf %2, %4 : vector<16x8xf32>
    %cst_5 = arith.constant 0.000000e+00 : f32
    %6 = vector.broadcast %cst_5 : f32 to vector<16x8xf32>
    %7 = arith.maximumf %5, %6 : vector<16x8xf32>
    %c0_6 = arith.constant 0 : index
    %c0_7 = arith.constant 0 : index
    %8 = vector.load %arg4[%c0_6, %c0_7] : memref<32x16xf32, #tpu.memory_space<vmem>>, vector<32x16xf32>
    %cst_8 = arith.constant dense<0.000000e+00> : vector<32x8xf32>
    %9 = tpu.matmul %8, %7, %cst_8 {dimension_numbers = #tpu.dot_dimension_numbers<[1], [0], [0], [1], [0, 0, 1, 1], [], []>} : vector<32x16xf32>, vector<16x8xf32>, vector<32x8xf32> -> vector<32x8xf32>
    %c0_9 = arith.constant 0 : index
    %c0_10 = arith.constant 0 : index
    %10 = vector.load %arg5[%c0_9, %c0_10] : memref<32x1xf32, #tpu.memory_space<vmem>>, vector<32x1xf32>
    %11 = vector.broadcast %10 : vector<32x1xf32> to vector<32x8xf32>
    %12 = arith.addf %9, %11 : vector<32x8xf32>
    %cst_11 = arith.constant 0.000000e+00 : f32
    %13 = vector.broadcast %cst_11 : f32 to vector<32x8xf32>
    %14 = arith.maximumf %12, %13 : vector<32x8xf32>
    %c0_12 = arith.constant 0 : index
    %c0_13 = arith.constant 0 : index
    %15 = vector.load %arg6[%c0_12, %c0_13] : memref<140x32xf32, #tpu.memory_space<vmem>>, vector<140x32xf32>
    %cst_14 = arith.constant dense<0.000000e+00> : vector<140x8xf32>
    %16 = tpu.matmul %15, %14, %cst_14 {dimension_numbers = #tpu.dot_dimension_numbers<[1], [0], [0], [1], [0, 0, 1, 1], [], []>} : vector<140x32xf32>, vector<32x8xf32>, vector<140x8xf32> -> vector<140x8xf32>
    %c0_15 = arith.constant 0 : index
    %c0_16 = arith.constant 0 : index
    %17 = vector.load %arg7[%c0_15, %c0_16] : memref<140x1xf32, #tpu.memory_space<vmem>>, vector<140x1xf32>
    %18 = vector.broadcast %17 : vector<140x1xf32> to vector<140x8xf32>
    %19 = arith.addf %16, %18 : vector<140x8xf32>
    %20 = arith.negf %19 : vector<140x8xf32>
    %21 = math.exp %20 : vector<140x8xf32>
    %cst_17 = arith.constant 1.000000e+00 : f32
    %22 = vector.broadcast %cst_17 : f32 to vector<140x8xf32>
    %23 = arith.addf %22, %21 : vector<140x8xf32>
    %24 = arith.divf %22, %23 : vector<140x8xf32>
    %c0_18 = arith.constant 0 : index
    %c0_19 = arith.constant 0 : index
    %25 = vector.load %arg8[%c0_18, %c0_19] : memref<140x8xf32, #tpu.memory_space<vmem>>, vector<140x8xf32>
    tpu.vector_store %arg8[%c0_18, %c0_19], %24 {strides = array<i32>} : memref<140x8xf32, #tpu.memory_space<vmem>>, vector<140x8xf32>,
    return
  }
  func.func @transform_0(%arg0: i32) -> (i32, i32) {
    %c0_i32 = arith.constant 0 : i32
    %c0_i32_0 = arith.constant 0 : i32
    return %c0_i32, %arg0 : i32, i32
  }
  func.func @transform_1(%arg0: i32) -> (i32, i32) {
    %c0_i32 = arith.constant 0 : i32
    %c0_i32_0 = arith.constant 0 : i32
    %c0_i32_1 = arith.constant 0 : i32
    return %c0_i32, %c0_i32_0 : i32, i32
  }
  func.func @transform_2(%arg0: i32) -> (i32, i32) {
    %c0_i32 = arith.constant 0 : i32
    %c0_i32_0 = arith.constant 0 : i32
    %c0_i32_1 = arith.constant 0 : i32
    return %c0_i32, %c0_i32_0 : i32, i32
  }
  func.func @transform_3(%arg0: i32) -> (i32, i32) {
    %c0_i32 = arith.constant 0 : i32
    %c0_i32_0 = arith.constant 0 : i32
    %c0_i32_1 = arith.constant 0 : i32
    return %c0_i32, %c0_i32_0 : i32, i32
  }
  func.func @transform_4(%arg0: i32) -> (i32, i32) {
    %c0_i32 = arith.constant 0 : i32
    %c0_i32_0 = arith.constant 0 : i32
    %c0_i32_1 = arith.constant 0 : i32
    return %c0_i32, %c0_i32_0 : i32, i32
  }
  func.func @transform_5(%arg0: i32) -> (i32, i32) {
    %c0_i32 = arith.constant 0 : i32
    %c0_i32_0 = arith.constant 0 : i32
    %c0_i32_1 = arith.constant 0 : i32
    return %c0_i32, %c0_i32_0 : i32, i32
  }
  func.func @transform_6(%arg0: i32) -> (i32, i32) {
    %c0_i32 = arith.constant 0 : i32
    %c0_i32_0 = arith.constant 0 : i32
    %c0_i32_1 = arith.constant 0 : i32
    return %c0_i32, %c0_i32_0 : i32, i32
  }
  func.func @transform_7(%arg0: i32) -> (i32, i32) {
    %c0_i32 = arith.constant 0 : i32
    %c0_i32_0 = arith.constant 0 : i32
    return %c0_i32, %arg0 : i32, i32
  }
}

</mosaic_0001>

<bundles_post_ra>
// kernel: decoder_forward.1
= control target key start
LH: loop header
LB: loop body
LE: loop exit
PB: predicated region body
PF: predicated region fallthrough
CT: control target
= control target key end

     0   :  { %vm41_vm0 = vcmask 64512   ;;  %v890_v0 = vmov 0   ;;  %vm101_vm1 = vcmask 130048   ;;  %vm273_vm2 = vcmask 261120   ;;  %s1382_s2 = inlined_call_operand.vmem [shape: f32[16,1], index: 2, kind: input, shape index: {}]   ;;  %s1383_s0 = inlined_call_operand.vmem [shape: f32[8,8], index: 0, kind: input, shape index: {}]   ;;  %s1384_s1 = inlined_call_operand.vmem [shape: f32[16,8], index: 1, kind: input, shape index: {}]   ;;  %s1385_s6 = inlined_call_operand.vmem [shape: f32[140,1], index: 6, kind: input, shape index: {}]   ;;  %s1386_s4 = inlined_call_operand.vmem [shape: f32[32,1], index: 4, kind: input, shape index: {}]   ;;  %s1387_s3 = inlined_call_operand.vmem [shape: f32[32,16], index: 3, kind: input, shape index: {}]   ;;  %s1388_s5 = inlined_call_operand.vmem [shape: f32[140,32], index: 5, kind: input, shape index: {}]   ;;  %s1389_s7 = inlined_call_operand.vmem [shape: f32[140,8], index: 7, kind: output, shape index: {}]  }
   0x1   :  { %815 = vset.pattern.permute.xlu0 %v890_v0  ;;  %v30_v1 = vld [vmem:[%s1382_s2 + $0x8] sm:$0xff]  ;;  %v26_v2 = vld [vmem:[%s1383_s0] sm:$0xff]  ;;  %816 = vset.pattern.permute.xlu1 %v890_v0  ;;  %v168_v7 = vld [vmem:[%s1385_s6 + $0x18] sm:$0xff] }
   0x2   :  { %v27_v3 = vld [vmem:[%s1384_s1] sm:$0xff]  ;;  %38 = vperm.xlu0 %815, %v30_v1   ;;  %63 = vmatpush.msra.mxu1 %v26_v2  ;;  %v28_v5 = vld [vmem:[%s1384_s1 + $0x8] sm:$0xff]  ;;  %v171_v8 = vld [vmem:[%s1385_s6 + $0x30] sm:$0xff] }
   0x3   :  { %764 = vmatmul.msk.f32.vlgmr.msra.gmra.mxu1 %vm41_vm0, %v27_v3  ;;  %817 = vset.pattern.permute.xlu2 %v890_v0  ;;  %v29_v4 = vld [vmem:[%s1382_s2] sm:$0xff]  ;;  %v174_v9 = vld [vmem:[%s1385_s6 + $0x48] sm:$0xff]  ;;  %v180_v11 = vld [vmem:[%s1385_s6 + $0x78] sm:$0xff] }
   0x4   :  { %v165_v6 = vld [vmem:[%s1385_s6] sm:$0xff]  ;;  %v80_v12 = vld [vmem:[%s1386_s4 + $0x18] sm:$0xff]  ;;  %v79_v13 = vld [vmem:[%s1386_s4 + $0x10] sm:$0xff] }
   0x5   :  { %v177_v10 = vld [vmem:[%s1385_s6 + $0x60] sm:$0xff]  ;;  %98 = vperm.xlu1 %816, %v80_v12   ;;  %v166_v14 = vld [vmem:[%s1385_s6 + $0x8] sm:$0xff]  ;;  %v172_v17 = vld [vmem:[%s1385_s6 + $0x38] sm:$0xff] }
   0x6   :  { %v169_v15 = vld [vmem:[%s1385_s6 + $0x20] sm:$0xff]  ;;  %v78_v16 = vld [vmem:[%s1386_s4 + $0x8] sm:$0xff]  ;;  %v175_v19 = vld [vmem:[%s1385_s6 + $0x50] sm:$0xff] }
   0x7   :  { %88 = vperm.xlu2 %817, %v78_v16   ;;  %v77_v18 = vld [vmem:[%s1386_s4] sm:$0xff]  ;;  %v167_v22 = vld [vmem:[%s1385_s6 + $0x10] sm:$0xff]  ;;  %v178_v23 = vld [vmem:[%s1385_s6 + $0x68] sm:$0xff] }
   0x8   :  { %v170_v26 = vld [vmem:[%s1385_s6 + $0x28] sm:$0xff]  ;;  %v181_v30 = vld [vmem:[%s1385_s6 + $0x80] sm:$0xff]  ;;  %v176_v35 = vld [vmem:[%s1385_s6 + $0x58] sm:$0xff] }
   0x9   :  { %v73_v32 = vld [vmem:[%s1387_s3] sm:$0xff]  ;;  %v74_v34 = vld [vmem:[%s1387_s3 + $0x8] sm:$0xff]  ;;  %v75_v36 = vld [vmem:[%s1387_s3 + $0x10] sm:$0xff] }
   0xa   :  { %33 = vperm.xlu0 %815, %v29_v4   ;;  %v173_v33 = vld [vmem:[%s1385_s6 + $0x40] sm:$0xff]  ;;  %v179_v37 = vld [vmem:[%s1385_s6 + $0x70] sm:$0xff]  ;;  %v76_v38 = vld [vmem:[%s1387_s3 + $0x18] sm:$0xff] }
   0xb   :  { %765 = vmatmul.msk.f32.gmra.mxu1 %vm41_vm0, %v28_v5  ;;  %v182_v39 = vld [vmem:[%s1385_s6 + $0x88] sm:$0xf]  ;;  %v147_v56 = vld [vmem:[%s1388_s5] sm:$0xff]  ;;  %v153_v57 = vld [vmem:[%s1388_s5 + $0x30] sm:$0xff] }
   0xc   :  { %v159_v58 = vld [vmem:[%s1388_s5 + $0x60] sm:$0xff]  ;;  %v148_v59 = vld [vmem:[%s1388_s5 + $0x8] sm:$0xff]  ;;  %v154_v60 = vld [vmem:[%s1388_s5 + $0x38] sm:$0xff] }
   0xd   :  { %93 = vperm.xlu1 %816, %v79_v13   ;;  %v160_v61 = vld [vmem:[%s1388_s5 + $0x68] sm:$0xff]  ;;  %v149_v62 = vld [vmem:[%s1388_s5 + $0x10] sm:$0xff]  ;;  %v155_v63 = vld [vmem:[%s1388_s5 + $0x40] sm:$0xff] }
   0xe   :  { %v161_v0 = vld [vmem:[%s1388_s5 + $0x70] sm:$0xff]  ;;  %v150_v1 = vld [vmem:[%s1388_s5 + $0x18] sm:$0xff]  ;;  %v156_v2 = vld [vmem:[%s1388_s5 + $0x48] sm:$0xff] }
   0xf   :  { %83 = vperm.xlu2 %817, %v77_v18   ;;  %v162_v3 = vld [vmem:[%s1388_s5 + $0x78] sm:$0xff]  ;;  %v151_v4 = vld [vmem:[%s1388_s5 + $0x20] sm:$0xff]  ;;  %v157_v5 = vld [vmem:[%s1388_s5 + $0x50] sm:$0xff] }
  0x12   :  { %185 = vperm.xlu0 %815, %v165_v6   ;;  %v163_v6 = vld [vmem:[%s1388_s5 + $0x80] sm:$0xff] }
  0x15   :  { %190 = vperm.xlu1 %816, %v166_v14  }
  0x17   :  { %195 = vperm.xlu2 %817, %v167_v22  }
  0x1a   :  { %200 = vperm.xlu0 %815, %v168_v7   ;;  %v152_v7 = vld [vmem:[%s1388_s5 + $0x28] sm:$0xff] }
  0x1d   :  { %205 = vperm.xlu1 %816, %v169_v15  }
  0x1f   :  { %210 = vperm.xlu2 %817, %v170_v26  }
  0x22   :  { %215 = vperm.xlu0 %815, %v171_v8   ;;  %v158_v8 = vld [vmem:[%s1388_s5 + $0x58] sm:$0xff] }
  0x25   :  { %220 = vperm.xlu1 %816, %v172_v17  }
  0x27   :  { %225 = vperm.xlu2 %817, %v173_v33  }
  0x2a   :  { %230 = vperm.xlu0 %815, %v174_v9   ;;  %v164_v9 = vld [vmem:[%s1388_s5 + $0x88] sm:$0xf] }
  0x2d   :  { %235 = vperm.xlu1 %816, %v175_v19  }
  0x2f   :  { %240 = vperm.xlu2 %817, %v176_v35  }
  0x32   :  { %245 = vperm.xlu0 %815, %v177_v10  }
  0x35   :  { %250 = vperm.xlu1 %816, %v178_v23  }
  0x37   :  { %255 = vperm.xlu2 %817, %v179_v37  }
  0x3a   :  { %260 = vperm.xlu0 %815, %v180_v11  }
  0x3d   :  { %265 = vperm.xlu1 %816, %v181_v30  }
  0x3f   :  { %270 = vperm.xlu2 %817, %v182_v39  }
  0x61   :  { %v89_v44 = vpop.permute.xlu2 %88 }
  0x69   :  { %v84_v51 = vpop.permute.xlu2 %83 }
  0x71   :  { %v196_v15 = vpop.permute.xlu2 %195 }
  0x74   :  { %v39_v20 = vpop.permute.xlu0 %38 }
  0x77   :  { %v99_v42 = vpop.permute.xlu1 %98 }
  0x79   :  { %v1108_v19 = vpop.permute.xlu2 %210 }
  0x7c   :  { %v34_v24 = vpop.permute.xlu0 %33 }
  0x7f   :  { %v94_v45 = vpop.permute.xlu1 %93 }
  0x80   :  { %v65_v21 = vpop.f32.mrf.mxu1 }
  0x81   :  { %v66_v27 = vadd.f32 %v65_v21, %v34_v24  ;;  %v226_v33 = vpop.permute.xlu2 %225 }
  0x83   :  { %v71_v31 = vmax.f32 %v66_v27, 0.0 }
  0x84   :  { %v186_v10 = vpop.permute.xlu0 %185 }
  0x87   :  { %v191_v11 = vpop.permute.xlu1 %190 }
  0x88   :  { %v68_v25 = vpop.f32.mrf.mxu1 }
  0x89   :  { %v69_v28 = vadd.f32 %v68_v25, %v39_v20 }
  0x8b   :  { %v72_v29 = vmax.f32 %v69_v28, 0.0 }
  0x8c   :  { %v1102_v12 = vpop.permute.xlu0 %200 }
  0x8d   :  { %128 = vmatpush.msrb.mxu1 %v72_v29 }
  0x8f   :  { %129 = vmatpush.msrb.mxu1 %v71_v31  ;;  %v1104_v13 = vpop.permute.xlu1 %205 }
  0x90   :  { %766 = vmatmul.msk.f32.vlgmr.msrb.gmra.mxu1 %vm101_vm1, %v73_v32 }
  0x94   :  { %v216_v14 = vpop.permute.xlu0 %215 }
  0x97   :  { %v221_v16 = vpop.permute.xlu1 %220 }
  0x98   :  { %767 = vmatmul.msk.f32.gmra.mxu1 %vm101_vm1, %v74_v34 }
  0x9c   :  { %v1106_v17 = vpop.permute.xlu0 %230 }
  0x9f   :  { %v1110_v22 = vpop.permute.xlu1 %235 }
  0xa0   :  { %768 = vmatmul.msk.f32.gmra.mxu1 %vm101_vm1, %v75_v36 }
  0xa4   :  { %v246_v23 = vpop.permute.xlu0 %245 }
  0xa7   :  { %v251_v36 = vpop.permute.xlu1 %250 }
  0xa8   :  { %769 = vmatmul.msk.f32.gmra.mxu1 %vm101_vm1, %v76_v38 }
 0x10d   :  { %v131_v40 = vpop.f32.mrf.mxu1 }
 0x10e   :  { %v132_v52 = vadd.f32 %v131_v40, %v84_v51  ;;  %v1116_v51 = vpop.permute.xlu2 %240 }
 0x110   :  { %v143_v55 = vmax.f32 %v132_v52, 0.0 }
 0x115   :  { %v134_v41 = vpop.f32.mrf.mxu1 }
 0x116   :  { %v135_v49 = vadd.f32 %v134_v41, %v89_v44 }
 0x118   :  { %v144_v54 = vmax.f32 %v135_v49, 0.0 }
 0x11d   :  { %v137_v43 = vpop.f32.mrf.mxu1 }
 0x11e   :  { %v138_v47 = vadd.f32 %v137_v43, %v94_v45 }
 0x120   :  { %v145_v53 = vmax.f32 %v138_v47, 0.0 }
 0x125   :  { %v140_v46 = vpop.f32.mrf.mxu1 }
 0x126   :  { %v141_v48 = vadd.f32 %v140_v46, %v99_v42 }
 0x128   :  { %v146_v50 = vmax.f32 %v141_v48, 0.0 }
 0x12a   :  { %340 = vmatpush.msra.mxu0 %v146_v50  ;;  %806 = vmatpush.msra.mxu2 %v146_v50 }
 0x12b   :  { %807 = vmatpush.msra.mxu3 %v146_v50 }
 0x12c   :  { %341 = vmatpush.msra.mxu0 %v145_v53  ;;  %808 = vmatpush.msra.mxu2 %v145_v53 }
 0x12d   :  { %809 = vmatpush.msra.mxu3 %v145_v53 }
 0x12e   :  { %342 = vmatpush.msra.mxu0 %v144_v54  ;;  %810 = vmatpush.msra.mxu2 %v144_v54 }
 0x12f   :  { %811 = vmatpush.msra.mxu3 %v144_v54 }
 0x130   :  { %343 = vmatpush.msra.mxu0 %v143_v55  ;;  %812 = vmatpush.msra.mxu2 %v143_v55 }
 0x131   :  { %813 = vmatpush.msra.mxu3 %v143_v55  ;;  %770 = vmatmul.msk.f32.vlgmr.msra.gmra.mxu0 %vm273_vm2, %v147_v56 }
 0x132   :  { %776 = vmatmul.msk.f32.vlgmr.msra.gmra.mxu2 %vm273_vm2, %v153_v57  ;;  %782 = vmatmul.msk.f32.vlgmr.msra.gmra.mxu3 %vm273_vm2, %v159_v58 }
 0x139   :  { %771 = vmatmul.msk.f32.gmra.mxu0 %vm273_vm2, %v148_v59 }
 0x13a   :  { %777 = vmatmul.msk.f32.gmra.mxu2 %vm273_vm2, %v154_v60  ;;  %783 = vmatmul.msk.f32.gmra.mxu3 %vm273_vm2, %v160_v61 }
 0x141   :  { %772 = vmatmul.msk.f32.gmra.mxu0 %vm273_vm2, %v149_v62 }
 0x142   :  { %778 = vmatmul.msk.f32.gmra.mxu2 %vm273_vm2, %v155_v63  ;;  %784 = vmatmul.msk.f32.gmra.mxu3 %vm273_vm2, %v161_v0 }
 0x149   :  { %773 = vmatmul.msk.f32.gmra.mxu0 %vm273_vm2, %v150_v1 }
 0x14a   :  { %779 = vmatmul.msk.f32.gmra.mxu2 %vm273_vm2, %v156_v2  ;;  %785 = vmatmul.msk.f32.gmra.mxu3 %vm273_vm2, %v162_v3 }
 0x151   :  { %774 = vmatmul.msk.f32.gmra.mxu0 %vm273_vm2, %v151_v4 }
 0x152   :  { %780 = vmatmul.msk.f32.gmra.mxu2 %vm273_vm2, %v157_v5  ;;  %786 = vmatmul.msk.f32.gmra.mxu3 %vm273_vm2, %v163_v6 }
 0x159   :  { %775 = vmatmul.msk.f32.gmra.mxu0 %vm273_vm2, %v152_v7 }
 0x15a   :  { %781 = vmatmul.msk.f32.gmra.mxu2 %vm273_vm2, %v158_v8  ;;  %787 = vmatmul.msk.f32.gmra.mxu3 %vm273_vm2, %v164_v9 }
 0x1ae   :  { %v345_v18 = vpop.f32.mrf.mxu0 }
 0x1af   :  { %v346_v20 = vadd.f32 %v345_v18, %v186_v10 }
 0x1b1   :  { %v788_v21 = vmul.f32 -1.442695, %v346_v20 }
 0x1b3   :  { %818 = vpow2.f32 %v788_v21 }
 0x1b5   :  { %v363_v24 = vpop.f32.mrf.mxu2  ;;  %v381_v25 = vpop.f32.mrf.mxu3 }
 0x1b6   :  { %v364_v26 = vadd.f32 %v363_v24, %v216_v14  ;;  %v382_v27 = vadd.f32 %v381_v25, %v246_v23  ;;  %v348_v28 = vpop.f32.mrf.mxu0 }
 0x1b7   :  { %v349_v29 = vadd.f32 %v348_v28, %v191_v11  ;;  %v256_v28 = vpop.permute.xlu2 %255 }
 0x1b8   :  { %v794_v30 = vmul.f32 -1.442695, %v364_v26  ;;  %v800_v31 = vmul.f32 -1.442695, %v382_v27 }
 0x1b9   :  { %v819_v32 = vpop.eup %818  ;;  %v789_v34 = vmul.f32 -1.442695, %v349_v29 }
 0x1ba   :  { %v453_v35 = vadd.f32 1.0, %v819_v32  ;;  %820 = vpow2.f32 %v794_v30 }
 0x1bb   :  { %822 = vpow2.f32 %v800_v31 }
 0x1bc   :  { %824 = vrcp.f32 %v453_v35  ;;  %v480_v53 = vand.u32 2147483647, %v453_v35  ;;  %v482_v54 = vand.u32 2147483648, %v453_v35  ;;  %vm476_vm3 = vweird.f32 %v453_v35 }
 0x1bd   :  { %826 = vpow2.f32 %v789_v34  ;;  %v366_v37 = vpop.f32.mrf.mxu2  ;;  %v384_v38 = vpop.f32.mrf.mxu3 }
 0x1be   :  { %v367_v39 = vadd.f32 %v366_v37, %v221_v16  ;;  %v385_v40 = vadd.f32 %v384_v38, %v251_v36  ;;  %v351_v41 = vpop.f32.mrf.mxu0  ;;  %vm1126_vm5 = vcmp.eq.f32.partialorder %v480_v53, 8.507059e+37  ;;  %v483_v3 = vor.u32 1.1754944e-38, %v482_v54 }
 0x1bf   :  { %v352_v44 = vadd.f32 %v351_v41, %v196_v15 }
 0x1c0   :  { %v821_v42 = vpop.eup %820  ;;  %v795_v43 = vmul.f32 -1.442695, %v367_v39  ;;  %v801_v49 = vmul.f32 -1.442695, %v385_v40 }
 0x1c1   :  { %v823_v45 = vpop.eup %822  ;;  %v1112_v46 = vadd.f32 1.0, %v821_v42  ;;  %v790_v55 = vmul.f32 -1.442695, %v352_v44 }
 0x1c2   :  { %v825_v47 = vpop.eup %824  ;;  %v1114_v48 = vadd.f32 1.0, %v823_v45  ;;  %828 = vpow2.f32 %v795_v43 }
 0x1c3   :  { %v827_v50 = vpop.eup %826  ;;  %v472_v52 = vmul.f32 %v825_v47, %v453_v35  ;;  %830 = vrcp.f32 %v1112_v46  ;;  %v570_v59 = vand.u32 2147483647, %v1112_v46  ;;  %v572_v60 = vand.u32 2147483648, %v1112_v46 }
 0x1c4   :  { %832 = vrcp.f32 %v1114_v48  ;;  %v1120_v57 = vadd.f32 1.0, %v827_v50  ;;  %vm477_vm4 = vweird.f32 %v825_v47  ;;  %v660_v63 = vand.u32 2147483647, %v1114_v48 }
 0x1c5   :  { %v473_v56 = vsub.f32 1.0, %v472_v52  ;;  %v369_v58 = vpop.f32.mrf.mxu2  ;;  %834 = vpow2.f32 %v801_v49  ;;  %v387_v0 = vpop.f32.mrf.mxu3  ;;  %v662_v4 = vand.u32 2147483648, %v1114_v48  ;;  %vm566_vm6 = vweird.f32 %v1112_v46  ;;  %vm478_vm7 = vmor %vm476_vm3, %vm477_vm4 }
 0x1c6   :  { %v370_v61 = vadd.f32 %v369_v58, %v226_v33  ;;  %836 = vrcp.f32 %v1120_v57  ;;  %vm1137_vm8 = vcmp.eq.f32.partialorder %v570_v59, 8.507059e+37  ;;  %v573_v14 = vor.u32 1.1754944e-38, %v572_v60  ;;  %v354_v40 = vpop.f32.mrf.mxu0 }
 0x1c7   :  { %v474_v62 = vmul.f32 %v825_v47, %v473_v56  ;;  %838 = vpow2.f32 %v790_v55  ;;  %vm656_vm9 = vweird.f32 %v1114_v48  ;;  %vm1143_vm10 = vcmp.eq.f32.partialorder %v660_v63, 8.507059e+37 }
 0x1c8   :  { %v829_v1 = vpop.eup %828  ;;  %v796_v8 = vmul.f32 -1.442695, %v370_v61  ;;  %v495_v20 = vand.u32 2147483647, %v1120_v57  ;;  %v663_v25 = vor.u32 1.1754944e-38, %v662_v4  ;;  %v497_v26 = vand.u32 2147483648, %v1120_v57 }
 0x1c9   :  { %v831_v5 = vpop.eup %830  ;;  %v475_v6 = vadd.f32 %v825_v47, %v474_v62  ;;  %v1132_v7 = vadd.f32 1.0, %v829_v1  ;;  %vm491_vm11 = vweird.f32 %v1120_v57  ;;  %v388_v34 = vadd.f32 %v387_v0, %v256_v28 }
 0x1ca   :  { %v833_v9 = vpop.eup %832  ;;  %v562_v10 = vmul.f32 %v831_v5, %v1112_v46  ;;  %vm567_vm12 = vweird.f32 %v831_v5  ;;  %vm1160_vm14 = vcmp.eq.f32.partialorder %v495_v20, 8.507059e+37  ;;  %v498_v39 = vor.u32 1.1754944e-38, %v497_v26 }
 0x1cb   :  { %v479_v15 = vsel %vm478_vm7, %v825_v47, %v475_v6  ;;  %v652_v16 = vmul.f32 %v833_v9, %v1114_v48  ;;  %840 = vrcp.f32 %v1132_v7  ;;  %v835_v21 = vpop.eup %834  ;;  %vm657_vm13 = vweird.f32 %v833_v9  ;;  %vm568_vm1 = vmor %vm566_vm6, %vm567_vm12 }
 0x1cc   :  { %v484_v23 = vsel %vm1126_vm5, %v483_v3, %v479_v15  ;;  %v563_v24 = vsub.f32 1.0, %v562_v10  ;;  %v837_v27 = vpop.eup %836  ;;  %v1157_v30 = vadd.f32 1.0, %v835_v21  ;;  %842 = vpow2.f32 %v796_v8  ;;  %vm658_vm2 = vmor %vm656_vm9, %vm657_vm13  ;;  %v261_v10 = vpop.permute.xlu0 %260 }
 0x1cd   :  { %741 = vst.msk [vmem:[%s1389_s7] sm:$0xff] %vm41_vm0, %v484_v23  ;;  %v653_v29 = vsub.f32 1.0, %v652_v16  ;;  %v839_v31 = vpop.eup %838  ;;  %v487_v33 = vmul.f32 %v837_v27, %v1120_v57  ;;  %vm581_vm15 = vweird.f32 %v1132_v7  ;;  %v372_v41 = vpop.f32.mrf.mxu2  ;;  %v585_v44 = vand.u32 2147483647, %v1132_v7 }
 0x1ce   :  { %v564_v32 = vmul.f32 %v831_v5, %v563_v24  ;;  %844 = vrcp.f32 %v1157_v30  ;;  %v587_v45 = vand.u32 2147483648, %v1132_v7  ;;  %v1170_v47 = vadd.f32 1.0, %v839_v31  ;;  %v390_v49 = vpop.f32.mrf.mxu3  ;;  %v357_v21 = vpop.f32.mrf.mxu0 }
 0x1cf   :  { %v654_v35 = vmul.f32 %v833_v9, %v653_v29  ;;  %v488_v38 = vsub.f32 1.0, %v487_v33  ;;  %vm492_vm3 = vweird.f32 %v837_v27  ;;  %v675_v56 = vand.u32 2147483647, %v1157_v30 }
 0x1d0   :  { %v565_v37 = vadd.f32 %v831_v5, %v564_v32  ;;  %v677_v58 = vand.u32 2147483648, %v1157_v30  ;;  %846 = vrcp.f32 %v1170_v47  ;;  %vm493_vm4 = vmor %vm491_vm11, %vm492_vm3  ;;  %vm1193_vm5 = vcmp.eq.f32.partialorder %v585_v44, 8.507059e+37  ;;  %v266_v32 = vpop.permute.xlu1 %265 }
 0x1d1   :  { %v841_v42 = vpop.eup %840  ;;  %v655_v43 = vadd.f32 %v833_v9, %v654_v35  ;;  %v489_v52 = vmul.f32 %v837_v27, %v488_v38  ;;  %v802_v0 = vmul.f32 -1.442695, %v388_v34  ;;  %v355_v1 = vadd.f32 %v354_v40, %v1102_v12 }
 0x1d2   :  { %v569_v50 = vsel %vm568_vm1, %v831_v5, %v565_v37  ;;  %v577_v53 = vmul.f32 %v841_v42, %v1132_v7  ;;  %v843_v54 = vpop.eup %842  ;;  %vm582_vm6 = vweird.f32 %v841_v42  ;;  %v588_v6 = vor.u32 1.1754944e-38, %v587_v45 }
 0x1d3   :  { %v574_v46 = vsel %vm1137_vm8, %v573_v14, %v569_v50  ;;  %v659_v55 = vsel %vm658_vm2, %v833_v9, %v655_v43  ;;  %v490_v59 = vadd.f32 %v837_v27, %v489_v52  ;;  %v1197_v63 = vadd.f32 1.0, %v843_v54  ;;  %vm583_vm9 = vmor %vm581_vm15, %vm582_vm6 }
 0x1d4   :  { %747 = vst.msk [vmem:[%s1389_s7 + $0x30] sm:$0xff] %vm41_vm0, %v574_v46  ;;  %v664_v48 = vsel %vm1143_vm10, %v663_v25, %v659_v55  ;;  %v578_v60 = vsub.f32 1.0, %v577_v53  ;;  %v845_v61 = vpop.eup %844  ;;  %vm671_vm7 = vweird.f32 %v1157_v30  ;;  %vm1209_vm8 = vcmp.eq.f32.partialorder %v675_v56, 8.507059e+37 }
 0x1d5   :  { %753 = vst.msk [vmem:[%s1389_s7 + $0x60] sm:$0xff] %vm41_vm0, %v664_v48  ;;  %v494_v2 = vsel %vm493_vm4, %v837_v27, %v490_v59  ;;  %v667_v4 = vmul.f32 %v845_v61, %v1157_v30  ;;  %848 = vrcp.f32 %v1197_v63  ;;  %v678_v9 = vor.u32 1.1754944e-38, %v677_v58  ;;  %v375_v23 = vpop.f32.mrf.mxu2 }
 0x1d6   :  { %v579_v3 = vmul.f32 %v841_v42, %v578_v60  ;;  %v499_v5 = vsel %vm1160_vm14, %v498_v39, %v494_v2  ;;  %vm506_vm10 = vweird.f32 %v1170_v47  ;;  %850 = vpow2.f32 %v802_v0  ;;  %v847_v15 = vpop.eup %846  ;;  %v393_v27 = vpop.f32.mrf.mxu3 }
 0x1d7   :  { %742 = vst.msk [vmem:[%s1389_s7 + $0x8] sm:$0xff] %vm41_vm0, %v499_v5  ;;  %v668_v12 = vsub.f32 1.0, %v667_v4  ;;  %v791_v11 = vmul.f32 -1.442695, %v355_v1  ;;  %v373_v14 = vadd.f32 %v372_v41, %v1106_v17  ;;  %vm672_vm11 = vweird.f32 %v845_v61 }
 0x1d8   :  { %v580_v57 = vadd.f32 %v841_v42, %v579_v3  ;;  %v391_v20 = vadd.f32 %v390_v49, %v261_v10  ;;  %v502_v25 = vmul.f32 %v847_v15, %v1170_v47  ;;  %v510_v7 = vand.u32 2147483647, %v1170_v47  ;;  %vm673_vm12 = vmor %vm671_vm7, %vm672_vm11 }
 0x1d9   :  { %v669_v18 = vmul.f32 %v845_v61, %v668_v12  ;;  %v512_v26 = vand.u32 2147483648, %v1170_v47  ;;  %852 = vpow2.f32 %v791_v11  ;;  %v797_v28 = vmul.f32 -1.442695, %v373_v14 }
 0x1da   :  { %v584_v16 = vsel %vm583_vm9, %v841_v42, %v580_v57  ;;  %v803_v29 = vmul.f32 -1.442695, %v391_v20  ;;  %v503_v33 = vsub.f32 1.0, %v502_v25  ;;  %vm507_vm13 = vweird.f32 %v847_v15 }
 0x1db   :  { %v589_v24 = vsel %vm1193_vm5, %v588_v6, %v584_v16  ;;  %v670_v17 = vadd.f32 %v845_v61, %v669_v18  ;;  %v849_v31 = vpop.eup %848  ;;  %v358_v34 = vadd.f32 %v357_v21, %v1104_v13  ;;  %v376_v35 = vadd.f32 %v375_v23, %v1110_v22  ;;  %vm508_vm15 = vmor %vm506_vm10, %vm507_vm13 }
 0x1dc   :  { %748 = vst.msk [vmem:[%s1389_s7 + $0x38] sm:$0xff] %vm41_vm0, %v589_v24  ;;  %v592_v37 = vmul.f32 %v849_v31, %v1197_v63  ;;  %854 = vpow2.f32 %v797_v28  ;;  %v394_v38 = vadd.f32 %v393_v27, %v266_v32  ;;  %v851_v39 = vpop.eup %850  ;;  %v504_v41 = vmul.f32 %v847_v15, %v503_v33 }
 0x1dd   :  { %v674_v36 = vsel %vm673_vm12, %v845_v61, %v670_v17  ;;  %856 = vpow2.f32 %v803_v29  ;;  %v792_v42 = vmul.f32 -1.442695, %v358_v34  ;;  %vm1238_vm14 = vcmp.eq.f32.partialorder %v510_v7, 8.507059e+37  ;;  %v360_v61 = vpop.f32.mrf.mxu0  ;;  %v378_v62 = vpop.f32.mrf.mxu2 }
 0x1de   :  { %v679_v40 = vsel %vm1209_vm8, %v678_v9, %v674_v36  ;;  %v593_v22 = vsub.f32 1.0, %v592_v37  ;;  %v1242_v30 = vadd.f32 1.0, %v851_v39  ;;  %v798_v43 = vmul.f32 -1.442695, %v376_v35 }
 0x1df   :  { %754 = vst.msk [vmem:[%s1389_s7 + $0x68] sm:$0xff] %vm41_vm0, %v679_v40  ;;  %v505_v44 = vadd.f32 %v847_v15, %v504_v41  ;;  %v600_v45 = vand.u32 2147483647, %v1197_v63  ;;  %v602_v49 = vand.u32 2147483648, %v1197_v63  ;;  %858 = vpow2.f32 %v792_v42  ;;  %v853_v50 = vpop.eup %852 }
 0x1e0   :  { %v513_v52 = vor.u32 1.1754944e-38, %v512_v26  ;;  %v594_v53 = vmul.f32 %v849_v31, %v593_v22  ;;  %vm597_vm1 = vweird.f32 %v849_v31  ;;  %860 = vrcp.f32 %v1242_v30 }
 0x1e1   :  { %v509_v54 = vsel %vm508_vm15, %v847_v15, %v505_v44  ;;  %v1250_v46 = vadd.f32 1.0, %v853_v50  ;;  %862 = vpow2.f32 %v798_v43  ;;  %v804_v55 = vmul.f32 -1.442695, %v394_v38 }
 0x1e2   :  { %v855_v56 = vpop.eup %854  ;;  %v514_v58 = vsel %vm1238_vm14, %v513_v52, %v509_v54  ;;  %v595_v48 = vadd.f32 %v849_v31, %v594_v53  ;;  %vm596_vm2 = vweird.f32 %v1197_v63  ;;  %vm601_vm4 = vcmp.eq.f32.partialorder %v600_v45, 8.507059e+37 }
 0x1e3   :  { %v857_v59 = vpop.eup %856  ;;  %743 = vst.msk [vmem:[%s1389_s7 + $0x10] sm:$0xff] %vm41_vm0, %v514_v58  ;;  %vm598_vm3 = vmor %vm596_vm2, %vm597_vm1  ;;  %v603_v47 = vor.u32 1.1754944e-38, %v602_v49  ;;  %v690_v60 = vand.u32 2147483647, %v1242_v30  ;;  %864 = vrcp.f32 %v1250_v46  ;;  %v692_v1 = vand.u32 2147483648, %v1242_v30 }
 0x1e4   :  { %v599_v0 = vsel %vm598_vm3, %v849_v31, %v595_v48  ;;  %v1262_v2 = vadd.f32 1.0, %v855_v56  ;;  %v1264_v63 = vadd.f32 1.0, %v857_v59  ;;  %866 = vpow2.f32 %v804_v55 }
 0x1e5   :  { %v859_v3 = vpop.eup %858  ;;  %v604_v4 = vsel %vm601_vm4, %v603_v47, %v599_v0  ;;  %v525_v6 = vand.u32 2147483647, %v1250_v46  ;;  %v361_v57 = vadd.f32 %v360_v61, %v1108_v19  ;;  %v379_v12 = vadd.f32 %v378_v62, %v1116_v51  ;;  %v396_v62 = vpop.f32.mrf.mxu3 }
 0x1e6   :  { %v861_v5 = vpop.eup %860  ;;  %749 = vst.msk [vmem:[%s1389_s7 + $0x40] sm:$0xff] %vm41_vm0, %v604_v4  ;;  %868 = vrcp.f32 %v1262_v2  ;;  %vm686_vm5 = vweird.f32 %v1242_v30  ;;  %vm1277_vm6 = vcmp.eq.f32.partialorder %v690_v60, 8.507059e+37  ;;  %v693_v11 = vor.u32 1.1754944e-38, %v692_v1  ;;  %v271_v4 = vpop.permute.xlu2 %270 }
 0x1e7   :  { %v863_v8 = vpop.eup %862  ;;  %v682_v9 = vmul.f32 %v861_v5, %v1242_v30  ;;  %870 = vrcp.f32 %v1264_v63  ;;  %vm521_vm7 = vweird.f32 %v1250_v46  ;;  %v527_v14 = vand.u32 2147483648, %v1250_v46 }
 0x1e8   :  { %v615_v51 = vand.u32 2147483647, %v1262_v2  ;;  %v1284_v16 = vadd.f32 1.0, %v859_v3  ;;  %v1286_v18 = vadd.f32 1.0, %v863_v8  ;;  %vm687_vm8 = vweird.f32 %v861_v5 }
 0x1e9   :  { %v865_v15 = vpop.eup %864  ;;  %v683_v19 = vsub.f32 1.0, %v682_v9  ;;  %vm1289_vm9 = vcmp.eq.f32.partialorder %v525_v6, 8.507059e+37  ;;  %v793_v23 = vmul.f32 -1.442695, %v361_v57  ;;  %v799_v24 = vmul.f32 -1.442695, %v379_v12  ;;  %vm688_vm12 = vmor %vm686_vm5, %vm687_vm8 }
 0x1ea   :  { %v517_v20 = vmul.f32 %v865_v15, %v1250_v46  ;;  %v867_v25 = vpop.eup %866  ;;  %v617_v26 = vand.u32 2147483648, %v1262_v2  ;;  %v705_v27 = vand.u32 2147483647, %v1264_v63  ;;  %872 = vrcp.f32 %v1284_v16 }
 0x1eb   :  { %v684_v7 = vmul.f32 %v861_v5, %v683_v19  ;;  %v528_v29 = vor.u32 1.1754944e-38, %v527_v14  ;;  %vm611_vm10 = vweird.f32 %v1262_v2  ;;  %874 = vrcp.f32 %v1286_v18 }
 0x1ec   :  { %v869_v17 = vpop.eup %868  ;;  %v518_v28 = vsub.f32 1.0, %v517_v20  ;;  %vm1299_vm11 = vcmp.eq.f32.partialorder %v615_v51, 8.507059e+37  ;;  %v707_v35 = vand.u32 2147483648, %v1264_v63  ;;  %vm522_vm13 = vweird.f32 %v865_v15 }
 0x1ed   :  { %v871_v31 = vpop.eup %870  ;;  %v685_v32 = vadd.f32 %v861_v5, %v684_v7  ;;  %v607_v33 = vmul.f32 %v869_v17, %v1262_v2  ;;  %vm701_vm14 = vweird.f32 %v1264_v63  ;;  %v618_v40 = vor.u32 1.1754944e-38, %v617_v26  ;;  %vm523_vm1 = vmor %vm521_vm7, %vm522_vm13 }
 0x1ee   :  { %v519_v36 = vmul.f32 %v865_v15, %v518_v28  ;;  %v697_v37 = vmul.f32 %v871_v31, %v1264_v63  ;;  %vm1309_vm15 = vcmp.eq.f32.partialorder %v705_v27, 8.507059e+37  ;;  %v1315_v30 = vadd.f32 1.0, %v867_v25 }
 0x1ef   :  { %v689_v38 = vsel %vm688_vm12, %v861_v5, %v685_v32  ;;  %v608_v39 = vsub.f32 1.0, %v607_v33  ;;  %vm612_vm2 = vweird.f32 %v869_v17  ;;  %v708_v45 = vor.u32 1.1754944e-38, %v707_v35 }
 0x1f0   :  { %v694_v42 = vsel %vm1277_vm6, %v693_v11, %v689_v38  ;;  %v520_v13 = vadd.f32 %v865_v15, %v519_v36  ;;  %v698_v22 = vsub.f32 1.0, %v697_v37  ;;  %v873_v43 = vpop.eup %872  ;;  %876 = vpow2.f32 %v793_v23  ;;  %vm613_vm4 = vmor %vm611_vm10, %vm612_vm2 }
 0x1f1   :  { %755 = vst.msk [vmem:[%s1389_s7 + $0x70] sm:$0xff] %vm41_vm0, %v694_v42  ;;  %v609_v44 = vmul.f32 %v869_v17, %v608_v39  ;;  %v875_v49 = vpop.eup %874  ;;  %vm702_vm3 = vweird.f32 %v871_v31  ;;  %v532_v53 = vmul.f32 %v873_v43, %v1284_v16  ;;  %v540_v56 = vand.u32 2147483647, %v1284_v16 }
 0x1f2   :  { %v524_v50 = vsel %vm523_vm1, %v865_v15, %v520_v13  ;;  %v699_v52 = vmul.f32 %v871_v31, %v698_v22  ;;  %v622_v58 = vmul.f32 %v875_v49, %v1286_v18  ;;  %v542_v59 = vand.u32 2147483648, %v1284_v16  ;;  %vm703_vm5 = vmor %vm701_vm14, %vm702_vm3 }
 0x1f3   :  { %v529_v54 = vsel %vm1289_vm9, %v528_v29, %v524_v50  ;;  %v610_v55 = vadd.f32 %v869_v17, %v609_v44  ;;  %v533_v48 = vsub.f32 1.0, %v532_v53  ;;  %878 = vrcp.f32 %v1315_v30 }
 0x1f4   :  { %744 = vst.msk [vmem:[%s1389_s7 + $0x18] sm:$0xff] %vm41_vm0, %v529_v54  ;;  %v700_v46 = vadd.f32 %v871_v31, %v699_v52  ;;  %vm537_vm6 = vweird.f32 %v873_v43  ;;  %v623_v60 = vsub.f32 1.0, %v622_v58  ;;  %v632_v61 = vand.u32 2147483648, %v1286_v18 }
 0x1f5   :  { %v614_v47 = vsel %vm613_vm4, %v869_v17, %v610_v55  ;;  %v534_v2 = vmul.f32 %v873_v43, %v533_v48  ;;  %880 = vpow2.f32 %v799_v24  ;;  %vm627_vm7 = vweird.f32 %v875_v49 }
 0x1f6   :  { %v619_v0 = vsel %vm1299_vm11, %v618_v40, %v614_v47  ;;  %v704_v1 = vsel %vm703_vm5, %v871_v31, %v700_v46  ;;  %v877_v3 = vpop.eup %876  ;;  %v624_v5 = vmul.f32 %v875_v49, %v623_v60  ;;  %v630_v6 = vand.u32 2147483647, %v1286_v18 }
 0x1f7   :  { %750 = vst.msk [vmem:[%s1389_s7 + $0x48] sm:$0xff] %vm41_vm0, %v619_v0  ;;  %v709_v63 = vsel %vm1309_vm15, %v708_v45, %v704_v1  ;;  %v535_v57 = vadd.f32 %v873_v43, %v534_v2  ;;  %vm536_vm8 = vweird.f32 %v1284_v16  ;;  %v458_v12 = vadd.f32 1.0, %v877_v3 }
 0x1f8   :  { %756 = vst.msk [vmem:[%s1389_s7 + $0x78] sm:$0xff] %vm41_vm0, %v709_v63  ;;  %v397_v8 = vadd.f32 %v396_v62, %v271_v4  ;;  %vm538_vm9 = vmor %vm536_vm8, %vm537_vm6  ;;  %v543_v9 = vor.u32 1.1754944e-38, %v542_v59  ;;  %v625_v10 = vadd.f32 %v875_v49, %v624_v5  ;;  %vm626_vm10 = vweird.f32 %v1286_v18 }
 0x1f9   :  { %v879_v11 = vpop.eup %878  ;;  %v539_v14 = vsel %vm538_vm9, %v873_v43, %v535_v57  ;;  %vm541_vm11 = vcmp.eq.f32.partialorder %v540_v56, 8.507059e+37  ;;  %vm628_vm12 = vmor %vm626_vm10, %vm627_vm7  ;;  %v633_v15 = vor.u32 1.1754944e-38, %v632_v61  ;;  %882 = vrcp.f32 %v458_v12 }
 0x1fa   :  { %v544_v19 = vsel %vm541_vm11, %v543_v9, %v539_v14  ;;  %v629_v51 = vsel %vm628_vm12, %v875_v49, %v625_v10  ;;  %vm631_vm13 = vcmp.eq.f32.partialorder %v630_v6, 8.507059e+37  ;;  %v712_v20 = vmul.f32 %v879_v11, %v1315_v30 }
 0x1fb   :  { %v881_v16 = vpop.eup %880  ;;  %745 = vst.msk [vmem:[%s1389_s7 + $0x20] sm:$0xff] %vm41_vm0, %v544_v19  ;;  %v634_v21 = vsel %vm631_vm13, %v633_v15, %v629_v51  ;;  %v805_v23 = vmul.f32 -1.442695, %v397_v8  ;;  %v722_v25 = vand.u32 2147483648, %v1315_v30  ;;  %vm717_vm14 = vweird.f32 %v879_v11 }
 0x1fc   :  { %751 = vst.msk [vmem:[%s1389_s7 + $0x50] sm:$0xff] %vm41_vm0, %v634_v21  ;;  %v713_v18 = vsub.f32 1.0, %v712_v20  ;;  %v464_v24 = vadd.f32 1.0, %v881_v16  ;;  %v720_v26 = vand.u32 2147483647, %v1315_v30  ;;  %vm716_vm15 = vweird.f32 %v1315_v30 }
 0x1fd   :  { %884 = vpow2.f32 %v805_v23  ;;  %vm718_vm1 = vmor %vm716_vm15, %vm717_vm14  ;;  %v723_v29 = vor.u32 1.1754944e-38, %v722_v25  ;;  %v557_v35 = vand.u32 2147483648, %v458_v12  ;;  %v555_v38 = vand.u32 2147483647, %v458_v12 }
 0x1fe   :  { %v714_v7 = vmul.f32 %v879_v11, %v713_v18  ;;  %886 = vrcp.f32 %v464_v24  ;;  %vm721_vm2 = vcmp.eq.f32.partialorder %v720_v26, 8.507059e+37  ;;  %vm551_vm4 = vweird.f32 %v458_v12 }
 0x1ff   :  { %v883_v27 = vpop.eup %882  ;;  %v558_v42 = vor.u32 1.1754944e-38, %v557_v35  ;;  %vm556_vm6 = vcmp.eq.f32.partialorder %v555_v38, 8.507059e+37  ;;  %v647_v30 = vand.u32 2147483648, %v464_v24  ;;  %v645_v45 = vand.u32 2147483647, %v464_v24 }
 0x200   :  { %v715_v17 = vadd.f32 %v879_v11, %v714_v7  ;;  %v547_v28 = vmul.f32 %v883_v27, %v458_v12  ;;  %vm552_vm3 = vweird.f32 %v883_v27  ;;  %vm641_vm8 = vweird.f32 %v464_v24 }
 0x201   :  { %vm553_vm5 = vmor %vm551_vm4, %vm552_vm3  ;;  %v648_v52 = vor.u32 1.1754944e-38, %v647_v30  ;;  %vm646_vm10 = vcmp.eq.f32.partialorder %v645_v45, 8.507059e+37  ;;  %vm758_vm14 = vcmask 60416  }
 0x202   :  { %v719_v31 = vsel %vm718_vm1, %v879_v11, %v715_v17  ;;  %v548_v32 = vsub.f32 1.0, %v547_v28 }
 0x203   :  { %v885_v33 = vpop.eup %884  ;;  %v724_v34 = vsel %vm721_vm2, %v723_v29, %v719_v31 }
 0x204   :  { %v887_v36 = vpop.eup %886  ;;  %757 = vst.msk [vmem:[%s1389_s7 + $0x80] sm:$0xff] %vm41_vm0, %v724_v34  ;;  %v549_v37 = vmul.f32 %v883_v27, %v548_v32  ;;  %v470_v39 = vadd.f32 1.0, %v885_v33 }
 0x205   :  { %v637_v40 = vmul.f32 %v887_v36, %v464_v24  ;;  %vm642_vm7 = vweird.f32 %v887_v36 }
 0x206   :  { %v550_v41 = vadd.f32 %v883_v27, %v549_v37  ;;  %888 = vrcp.f32 %v470_v39  ;;  %vm643_vm9 = vmor %vm641_vm8, %vm642_vm7  ;;  %v737_v58 = vand.u32 2147483648, %v470_v39  ;;  %v735_v48 = vand.u32 2147483647, %v470_v39 }
 0x207   :  { %v638_v13 = vsub.f32 1.0, %v637_v40  ;;  %vm731_vm12 = vweird.f32 %v470_v39 }
 0x208   :  { %v554_v22 = vsel %vm553_vm5, %v883_v27, %v550_v41  ;;  %v738_v47 = vor.u32 1.1754944e-38, %v737_v58  ;;  %vm736_vm15 = vcmp.eq.f32.partialorder %v735_v48, 8.507059e+37 }
 0x209   :  { %v559_v43 = vsel %vm556_vm6, %v558_v42, %v554_v22  ;;  %v639_v44 = vmul.f32 %v887_v36, %v638_v13 }
 0x20a   :  { %746 = vst.msk [vmem:[%s1389_s7 + $0x28] sm:$0xff] %vm41_vm0, %v559_v43 }
 0x20b   :  { %v640_v49 = vadd.f32 %v887_v36, %v639_v44 }
 0x20c   :  { %v889_v50 = vpop.eup %888 }
 0x20d   :  { %v644_v53 = vsel %vm643_vm9, %v887_v36, %v640_v49  ;;  %v727_v54 = vmul.f32 %v889_v50, %v470_v39  ;;  %vm732_vm11 = vweird.f32 %v889_v50 }
 0x20e   :  { %v649_v55 = vsel %vm646_vm10, %v648_v52, %v644_v53  ;;  %vm733_vm13 = vmor %vm731_vm12, %vm732_vm11 }
 0x20f   :  { %752 = vst.msk [vmem:[%s1389_s7 + $0x58] sm:$0xff] %vm41_vm0, %v649_v55  ;;  %v728_v56 = vsub.f32 1.0, %v727_v54 }
 0x211   :  { %v729_v46 = vmul.f32 %v889_v50, %v728_v56 }
 0x213   :  { %v730_v59 = vadd.f32 %v889_v50, %v729_v46 }
 0x215   :  { %v734_v60 = vsel %vm733_vm13, %v889_v50, %v730_v59 }
 0x216   :  { %v739_v61 = vsel %vm736_vm15, %v738_v47, %v734_v60 }
 0x217   :  { %759 = vst.msk [vmem:[%s1389_s7 + $0x88] sm:$0xf] %vm758_vm14, %v739_v61 }

</bundles_post_ra>
